<compile_context>
chip_gen: v6e
topology: v6e:2x2x1
jax: 0.10.0
libtpu: 0.0.40
codegen_flags: <defaults>
</compile_context>

<pallas_src>
import jax
import jax.numpy as jnp
from jax.experimental import pallas as pl
from jax.experimental.pallas import tpu as pltpu


def attention_kernel(pp_ref, img_ref, wq_ref, wk_ref, wv_ref, wo_ref, bo_ref, o_ref):
    """Fused attention: projections + scores + softmax + out projection.

    pp_ref : (B, N, Dq)  f32
    img_ref: (B, M, Dc)  f32
    wq_ref : (Dq, Di)    bf16, pre-transposed, scale folded in
    wk_ref : (Dc, Dc)    bf16, pre-transposed
    wv_ref : (Dc, Dc)    bf16, pre-transposed
    wo_ref : (Di, Dq_pad) bf16, pre-transposed, zero-padded to 128 lanes
    bo_ref : (1, Dq_pad)  f32, zero-padded
    o_ref  : (B, N, Dq_pad) f32 (lane-dense slab; wrapper slices back to Dq)
    """
    B, N, Dq = pp_ref.shape
    _, M, Dc = img_ref.shape

    # bf16 MXU operands, f32 accumulation.
    x = pp_ref[...].astype(jnp.bfloat16).reshape(B * N, Dq)
    ctx = img_ref[...].astype(jnp.bfloat16).reshape(B * M, Dc)

    # Projections (scale is pre-folded into wq).
    q = jnp.dot(x, wq_ref[...], preferred_element_type=jnp.float32).reshape(B, N, -1)
    k = jnp.dot(ctx, wk_ref[...], preferred_element_type=jnp.float32).reshape(B, M, Dc)
    v = jnp.dot(ctx, wv_ref[...], preferred_element_type=jnp.float32).reshape(B, M, Dc)

    # Scores: batched contraction over the feature dim (no k.T materialized).
    s = jnp.einsum('bnc,bmc->bnm',
                   q.astype(jnp.bfloat16), k.astype(jnp.bfloat16),
                   preferred_element_type=jnp.float32)                       # (B, N, M)

    # Numerically stable softmax in f32 with deferred normalization.
    s = s - jnp.max(s, axis=-1, keepdims=True)
    p = jnp.exp(s)                                                           # f32
    row_sum = jnp.sum(p, axis=-1, keepdims=True)                             # (B, N, 1)

    # Attention output with unnormalized probabilities, then normalize the
    # small (B, N, Dc) tensor using the EUP reciprocal (off the VALU path).
    out = jnp.einsum('bnm,bmc->bnc',
                     p.astype(jnp.bfloat16), v.astype(jnp.bfloat16),
                     preferred_element_type=jnp.float32)                     # (B, N, Dc)
    out = out * pl.reciprocal(row_sum, approx=True)

    # Final projection into the lane-dense padded slab (+ bias).
    y = jnp.dot(out.reshape(B * N, -1).astype(jnp.bfloat16), wo_ref[...],
                preferred_element_type=jnp.float32) + bo_ref[...]            # (B*N, Dq_pad)
    o_ref[...] = y.reshape(B, N, -1).astype(o_ref.dtype)


def prepare_params(params, scale):
    """One-time parameter transform: pre-transpose, fold scale, bf16 weights,
    zero-pad the output projection to a 128-lane-dense slab."""
    wq, wk, wv, wo, bo = params                     # torch Linear layout: (out, in)
    query_dim, inner_dim = wo.shape
    dq_pad = ((query_dim + 127) // 128) * 128

    wq_t = (wq * scale).T.astype(jnp.bfloat16)      # (Dq, Di), scale folded
    wk_t = wk.T.astype(jnp.bfloat16)                # (Dc, Dc)
    wv_t = wv.T.astype(jnp.bfloat16)                # (Dc, Dc)

    wo_pad = jnp.zeros((inner_dim, dq_pad), jnp.float32).at[:, :query_dim].set(wo.T)
    wo_pad = wo_pad.astype(jnp.bfloat16)            # (Di, Dq_pad)
    bo_pad = jnp.zeros((1, dq_pad), jnp.float32).at[0, :query_dim].set(bo)   # (1, Dq_pad)
    return wq_t, wk_t, wv_t, wo_pad, bo_pad


def attention_forward(point_public, image_feats, prepared_params):
    """prepared_params = output of prepare_params()."""
    B, N, Dq = point_public.shape
    _, M, Dc = image_feats.shape
    wq_t, wk_t, wv_t, wo_pad, bo_pad = prepared_params
    Di = wq_t.shape[1]
    Dq_pad = wo_pad.shape[1]

    # The 'bnc,bmc->bnm' contraction between q (inner_dim) and k (context_dim)
    # requires inner_dim == context_dim (same as the reference module's usage).
    assert Di == Dc, f"inner_dim ({Di}) must equal context_dim ({Dc})"

    flops = 2 * (B * N * Dq * Di          # q projection
                 + 2 * B * M * Dc * Dc    # k, v projections
                 + B * N * M * Di         # scores
                 + B * N * M * Dc         # p @ v
                 + B * N * Di * Dq_pad)   # out projection
    transcendentals = B * N * M           # exp (softmax); reciprocal is negligible
    bytes_accessed = (point_public.size * 4 + image_feats.size * 4
                      + (wq_t.size + wk_t.size + wv_t.size + wo_pad.size) * 2
                      + bo_pad.size * 4 + B * N * Dq_pad * 4)

    vmem = pl.BlockSpec(memory_space=pltpu.MemorySpace.VMEM)
    y = pl.pallas_call(
        attention_kernel,
        out_shape=jax.ShapeDtypeStruct((B, N, Dq_pad), point_public.dtype),
        in_specs=[vmem] * 7,
        out_specs=vmem,
        cost_estimate=pl.CostEstimate(flops=flops,
                                      transcendentals=transcendentals,
                                      bytes_accessed=int(bytes_accessed)),
    )(point_public, image_feats, wq_t, wk_t, wv_t, wo_pad, bo_pad)
    return y[..., :Dq]


def reference_forward(point_public, image_feats, params, scale):
    wq, wk, wv, wo, bo = params
    q = point_public @ wq.T
    k = image_feats @ wk.T
    v = image_feats @ wv.T
    s = jnp.einsum('bnc,bmc->bnm', q, k) * scale
    p = jax.nn.softmax(s, axis=-1)
    out = jnp.matmul(p, v)
    return out @ wo.T + bo


if __name__ == "__main__":
    # Module config (small; consistent with the inner_dim == context_dim requirement)
    query_dim = 32
    context_dim = 16
    heads = 1
    dim_head = 16
    inner_dim = heads * dim_head        # == context_dim == 16
    scale = dim_head ** (-0.5)

    B, N, M = 2, 8, 16

    key = jax.random.PRNGKey(0)
    kpp, kimg, kq, kk, kv, ko, kb = jax.random.split(key, 7)

    point_public = jax.random.normal(kpp, (B, N, query_dim), dtype=jnp.float32)
    image_feats = jax.random.normal(kimg, (B, M, context_dim), dtype=jnp.float32)

    # Deterministic parameter init (torch.nn.Linear weight shapes: (out, in))
    wq = jax.random.normal(kq, (inner_dim, query_dim), dtype=jnp.float32) * 0.1
    wk = jax.random.normal(kk, (context_dim, context_dim), dtype=jnp.float32) * 0.1
    wv = jax.random.normal(kv, (context_dim, context_dim), dtype=jnp.float32) * 0.1
    wo = jax.random.normal(ko, (query_dim, inner_dim), dtype=jnp.float32) * 0.1
    bo = jax.random.normal(kb, (query_dim,), dtype=jnp.float32) * 0.1
    params = (wq, wk, wv, wo, bo)

    prepared = prepare_params(params, scale)      # one-time parameter transform

    out = attention_forward(point_public, image_feats, prepared)
    out = jax.block_until_ready(out)

    ref = reference_forward(point_public, image_feats, params, scale)
    assert out.shape == (B, N, query_dim)
    # Tolerance accounts for bf16 MXU operands (f32 accumulation) and the
    # approximate EUP reciprocal used for the deferred softmax normalization.
    assert jnp.allclose(out, ref, atol=2e-2, rtol=2e-2), "mismatch vs reference"

    print("KERNEL_OK")
</pallas_src>

<mosaic_0001>
module attributes {stable_mosaic.version = 11 : i64} {
  func.func @attention_kernel(%arg0: memref<2x8x32xf32, #tpu.memory_space<vmem>>, %arg1: memref<2x16x16xf32, #tpu.memory_space<vmem>>, %arg2: memref<32x16xbf16, #tpu.memory_space<vmem>>, %arg3: memref<16x16xbf16, #tpu.memory_space<vmem>>, %arg4: memref<16x16xbf16, #tpu.memory_space<vmem>>, %arg5: memref<16x128xbf16, #tpu.memory_space<vmem>>, %arg6: memref<1x128xf32, #tpu.memory_space<vmem>>, %arg7: memref<2x8x128xf32, #tpu.memory_space<vmem>>) attributes {dimension_semantics = [], scalar_prefetch = 0 : i64, scratch_operands = 0 : i64, tpu.core_type = #tpu.core_type<tc>} {
    %c0 = arith.constant 0 : index
    %c0_0 = arith.constant 0 : index
    %c0_1 = arith.constant 0 : index
    %0 = vector.load %arg0[%c0, %c0_0, %c0_1] : memref<2x8x32xf32, #tpu.memory_space<vmem>>, vector<2x8x32xf32>
    %1 = arith.truncf %0 : vector<2x8x32xf32> to vector<2x8x32xbf16>
    %2 = vector.shape_cast %1 : vector<2x8x32xbf16> to vector<16x32xbf16>
    %c0_2 = arith.constant 0 : index
    %c0_3 = arith.constant 0 : index
    %c0_4 = arith.constant 0 : index
    %3 = vector.load %arg1[%c0_2, %c0_3, %c0_4] : memref<2x16x16xf32, #tpu.memory_space<vmem>>, vector<2x16x16xf32>
    %4 = arith.truncf %3 : vector<2x16x16xf32> to vector<2x16x16xbf16>
    %5 = vector.shape_cast %4 : vector<2x16x16xbf16> to vector<32x16xbf16>
    %c0_5 = arith.constant 0 : index
    %c0_6 = arith.constant 0 : index
    %6 = vector.load %arg2[%c0_5, %c0_6] : memref<32x16xbf16, #tpu.memory_space<vmem>>, vector<32x16xbf16>
    %cst = arith.constant dense<0.000000e+00> : vector<16x16xf32>
    %7 = tpu.matmul %2, %6, %cst {dimension_numbers = #tpu.dot_dimension_numbers<[1], [0], [0], [1], [0, 0, 1, 1], [], []>} : vector<16x32xbf16>, vector<32x16xbf16>, vector<16x16xf32> -> vector<16x16xf32>
    %8 = vector.shape_cast %7 : vector<16x16xf32> to vector<2x8x16xf32>
    %c0_7 = arith.constant 0 : index
    %c0_8 = arith.constant 0 : index
    %9 = vector.load %arg3[%c0_7, %c0_8] : memref<16x16xbf16, #tpu.memory_space<vmem>>, vector<16x16xbf16>
    %cst_9 = arith.constant dense<0.000000e+00> : vector<32x16xf32>
    %10 = tpu.matmul %5, %9, %cst_9 {dimension_numbers = #tpu.dot_dimension_numbers<[1], [0], [0], [1], [0, 0, 1, 1], [], []>} : vector<32x16xbf16>, vector<16x16xbf16>, vector<32x16xf32> -> vector<32x16xf32>
    %11 = vector.shape_cast %10 : vector<32x16xf32> to vector<2x16x16xf32>
    %c0_10 = arith.constant 0 : index
    %c0_11 = arith.constant 0 : index
    %12 = vector.load %arg4[%c0_10, %c0_11] : memref<16x16xbf16, #tpu.memory_space<vmem>>, vector<16x16xbf16>
    %cst_12 = arith.constant dense<0.000000e+00> : vector<32x16xf32>
    %13 = tpu.matmul %5, %12, %cst_12 {dimension_numbers = #tpu.dot_dimension_numbers<[1], [0], [0], [1], [0, 0, 1, 1], [], []>} : vector<32x16xbf16>, vector<16x16xbf16>, vector<32x16xf32> -> vector<32x16xf32>
    %14 = vector.shape_cast %13 : vector<32x16xf32> to vector<2x16x16xf32>
    %15 = arith.truncf %8 : vector<2x8x16xf32> to vector<2x8x16xbf16>
    %16 = arith.truncf %11 : vector<2x16x16xf32> to vector<2x16x16xbf16>
    "tpu.trace_start"() <{level = 10 : i32, message = "bnc,bmc->bnm"}> : () -> ()
    %cst_13 = arith.constant dense<0.000000e+00> : vector<2x8x16xf32>
    %17 = tpu.matmul %15, %16, %cst_13 {dimension_numbers = #tpu.dot_dimension_numbers<[2], [2], [1], [1], [0, 0, 0, 1, 1, 1], [0], [0]>} : vector<2x8x16xbf16>, vector<2x16x16xbf16>, vector<2x8x16xf32> -> vector<2x8x16xf32>
    "tpu.trace_stop"() : () -> ()
    %cst_14 = arith.constant dense<0xFF800000> : vector<2x8xf32>
    %18 = vector.multi_reduction <maximumf>, %17, %cst_14 [2] : vector<2x8x16xf32> to vector<2x8xf32>
    %19 = vector.shape_cast %18 : vector<2x8xf32> to vector<2x8x1xf32>
    %20 = vector.broadcast %19 : vector<2x8x1xf32> to vector<2x8x16xf32>
    %21 = arith.subf %17, %20 : vector<2x8x16xf32>
    %22 = math.exp %21 : vector<2x8x16xf32>
    %cst_15 = arith.constant dense<0.000000e+00> : vector<2x8xf32>
    %23 = vector.multi_reduction <add>, %22, %cst_15 [2] : vector<2x8x16xf32> to vector<2x8xf32>
    %24 = vector.shape_cast %23 : vector<2x8xf32> to vector<2x8x1xf32>
    %25 = arith.truncf %22 : vector<2x8x16xf32> to vector<2x8x16xbf16>
    %26 = arith.truncf %14 : vector<2x16x16xf32> to vector<2x16x16xbf16>
    "tpu.trace_start"() <{level = 10 : i32, message = "bnm,bmc->bnc"}> : () -> ()
    %cst_16 = arith.constant dense<0.000000e+00> : vector<2x8x16xf32>
    %27 = tpu.matmul %25, %26, %cst_16 {dimension_numbers = #tpu.dot_dimension_numbers<[2], [1], [1], [2], [0, 0, 0, 1, 1, 2], [0], [0]>} : vector<2x8x16xbf16>, vector<2x16x16xbf16>, vector<2x8x16xf32> -> vector<2x8x16xf32>
    "tpu.trace_stop"() : () -> ()
    %28 = tpu.reciprocal %24 {approx = true} : vector<2x8x1xf32> -> vector<2x8x1xf32>
    %29 = vector.broadcast %28 : vector<2x8x1xf32> to vector<2x8x16xf32>
    %30 = arith.mulf %27, %29 : vector<2x8x16xf32>
    %31 = vector.shape_cast %30 : vector<2x8x16xf32> to vector<16x16xf32>
    %32 = arith.truncf %31 : vector<16x16xf32> to vector<16x16xbf16>
    %c0_17 = arith.constant 0 : index
    %c0_18 = arith.constant 0 : index
    %33 = vector.load %arg5[%c0_17, %c0_18] : memref<16x128xbf16, #tpu.memory_space<vmem>>, vector<16x128xbf16>
    %cst_19 = arith.constant dense<0.000000e+00> : vector<16x128xf32>
    %34 = tpu.matmul %32, %33, %cst_19 {dimension_numbers = #tpu.dot_dimension_numbers<[1], [0], [0], [1], [0, 0, 1, 1], [], []>} : vector<16x16xbf16>, vector<16x128xbf16>, vector<16x128xf32> -> vector<16x128xf32>
    %c0_20 = arith.constant 0 : index
    %c0_21 = arith.constant 0 : index
    %35 = vector.load %arg6[%c0_20, %c0_21] : memref<1x128xf32, #tpu.memory_space<vmem>>, vector<1x128xf32>
    %36 = vector.broadcast %35 : vector<1x128xf32> to vector<16x128xf32>
    %37 = arith.addf %34, %36 : vector<16x128xf32>
    %38 = vector.shape_cast %37 : vector<16x128xf32> to vector<2x8x128xf32>
    %c0_22 = arith.constant 0 : index
    %c0_23 = arith.constant 0 : index
    %c0_24 = arith.constant 0 : index
    %39 = vector.load %arg7[%c0_22, %c0_23, %c0_24] : memref<2x8x128xf32, #tpu.memory_space<vmem>>, vector<2x8x128xf32>
    tpu.vector_store %arg7[%c0_22, %c0_23, %c0_24], %38 {strides = array<i32>} : memref<2x8x128xf32, #tpu.memory_space<vmem>>, vector<2x8x128xf32>,
    return
  }
}

</mosaic_0001>

<bundles_post_ra>
// kernel: tpu_custom_call.1
= control target key start
LH: loop header
LB: loop body
LE: loop exit
PB: predicated region body
PF: predicated region fallthrough
CT: control target
= control target key end

     0   :  { %12 = vsyncpa [#allocation3], 0  ;;  %s835_s0 = inlined_call_operand.vmem [shape: f32[2,8,32], index: 0, kind: input, shape index: {}]   ;;  %s836_s1 = inlined_call_operand.hbm [shape: f32[2,16,16], index: 1, kind: input, shape index: {}]   ;;  %s837_s2 = inlined_call_operand.vmem [shape: bf16[32,16], index: 2, kind: input, shape index: {}]   ;;  %s838_s3 = inlined_call_operand.vmem [shape: bf16[16,16], index: 3, kind: input, shape index: {}]   ;;  %s839_s4 = inlined_call_operand.hbm [shape: bf16[16,16], index: 4, kind: input, shape index: {}]   ;;  %s840_s5 = inlined_call_operand.vmem [shape: bf16[16,128], index: 5, kind: input, shape index: {}]   ;;  %s841_s6 = inlined_call_operand.vmem [shape: f32[1,128], index: 6, kind: input, shape index: {}]   ;;  %s842_s7 = inlined_call_operand.hbm [shape: f32[2,8,128], index: 7, kind: output, shape index: {}]  }
   0x1   :  { %13 = vsyncpa [#allocation6], 0 }
   0x2   :  { %14 = vsyncpa [#allocation4], 0  ;;  %s716_s24 = smov [#allocation2]  }
   0x3   :  { %s22_s25 = sshll.u32 %s716_s24, 4  ;;  %s23_s25 = int_to_ptr.vmem [resolvable:$true] %s22_s25 }
   0x4   :  { %s658_s26 = scalar_lea.vmem %s23_s25, 512  ;;  %p663_p1 = scmp.lt.s32.totalorder %s23_s25, %s23_s25 }
   0x5   :  { %p659_p0 = scmp.ne.s32.totalorder %s23_s25, %s658_s26  ;;  %p664_p2 = scmp.lt.s32.totalorder %s658_s26, %s658_s26 }
   0x7   :  { %p665_p3 = por %p664_p2, %p663_p1 }
   0x9   :  { %p666_p4 = pnand %p665_p3, %p659_p0 }
   0xb   :  { %669 = shalt.err (!%p666_p4)
}
   0xc   :  { %s717_s27 = smov 128   ;;  %s718_s28 = smov 8  }
   0xd   :  { %28 = dma.hbm_to_vmem [thread:$0]  %s836_s1, 512, %s23_s25, [#allocation3], %s717_s27, %s717_s27, %s718_s28  }
   0xe   :  { %s719_s8 = smov [#allocation5]  }
   0xf   :  { %s38_s9 = sshll.u32 %s719_s8, 4  ;;  %s39_s9 = int_to_ptr.vmem [resolvable:$true] %s38_s9 }
  0x10   :  { %s678_s10 = scalar_lea.vmem %s39_s9, 128  ;;  %p683_p6 = scmp.lt.s32.totalorder %s39_s9, %s39_s9 }
  0x11   :  { %p679_p5 = scmp.ne.s32.totalorder %s39_s9, %s678_s10  ;;  %p684_p7 = scmp.lt.s32.totalorder %s678_s10, %s678_s10 }
  0x13   :  { %p685_p8 = por %p684_p7, %p683_p6 }
  0x15   :  { %p686_p9 = pnand %p685_p8, %p679_p5 }
  0x17   :  { %689 = shalt.err (!%p686_p9)
}
  0x18   :  { %s720_s11 = smov 64   ;;  %s721_s12 = smov 4  }
  0x19   :  { %44 = dma.hbm_to_vmem [thread:$0]  %s839_s4, 128, %s39_s9, [#allocation6], %s720_s11, %s720_s11, %s721_s12  }
  0x1a   :  { %710 = dma.done.wait [#allocation3], 512  }
  0x1b   :  { %711 = vsyncadd [#allocation3], 4294966784 }
  0x1c   :  { %712 = dma.done.wait [#allocation6], 128  }
  0x1d   :  { %713 = vsyncadd [#allocation6], 4294967168  ;;  %v722_v0 = vmov 0.0   ;;  %vm723_vm0 = vmmov 0   ;;  %v637_v1 = vld [vmem:[%s838_s3] sm:$0xff]   ;;  %v61_v3 = vld [vmem:[#allocation2 + $0x8] sm:$0xff] }
  0x1e   :  { %578 = vmatprep.subr.bf16.mxu0 %v722_v0  ;;  %582 = vmatprep.mubr.msk.bf16.mxu0 %vm723_vm0, %v722_v0  ;;  %v60_v2 = vld [vmem:[#allocation2] sm:$0xff]  ;;  %vm140_vm1 = vcmask 130048   ;;  %v62_v4 = vld [vmem:[#allocation2 + $0x10] sm:$0xff]  ;;  %v63_v6 = vld [vmem:[#allocation2 + $0x18] sm:$0xff]  ;;  %vm87_vm2 = vcmask 261120   ;;  %s724_s23 = smov [#allocation7]  }
  0x1f   :  { %586 = vmatprep.subr.bf16.mxu1 %v637_v1  ;;  %v64_v5 = vpack.c.bf16 %v61_v3, %v60_v2  ;;  %v65_v7 = vpack.c.bf16 %v63_v6, %v62_v4  ;;  %v638_v8 = vld [vmem:[%s837_s2 + $0x8] sm:$0xff]   ;;  %v639_v9 = vld [vmem:[%s837_s2] sm:$0xff]   ;;  %s528_s24 = sshll.u32 %s724_s23, 4  ;;  %s529_s24 = int_to_ptr.vmem [resolvable:$true] %s528_s24 }
  0x20   :  { %587 = vmatpush3.bf16.msra.mxu1 %v637_v1  ;;  %v56_v10 = vld [vmem:[%s835_s0] sm:$0xff]  ;;  %v57_v11 = vld [vmem:[%s835_s0 + $0x8] sm:$0xff]  ;;  %579 = vmatpush3.bf16.msra.mxu0 %v638_v8  ;;  %s690_s25 = scalar_lea.vmem %s529_s24, 256  ;;  %p695_p11 = scmp.lt.s32.totalorder %s529_s24, %s529_s24 }
  0x21   :  { %588 = vmatprep.mubr.msk.bf16.mxu1 %vm140_vm1, %v64_v5  ;;  %580 = vmatprep.subr.bf16.mxu0 %v722_v0  ;;  %v558_v12 = vpack.c.bf16 %v57_v11, %v56_v10  ;;  %v640_v13 = vld [vmem:[#allocation5] sm:$0xff]   ;;  %p691_p10 = scmp.ne.s32.totalorder %s529_s24, %s690_s25  ;;  %p696_p12 = scmp.lt.s32.totalorder %s690_s25, %s690_s25 }
  0x22   :  { %592 = vmatprep.subr.bf16.mxu1 %v640_v13  ;;  %v641_v56 = vld [vmem:[%s840_s5] sm:$0xff]  }
  0x23   :  { %589 = vmatmul.mubr.msk.bf16.vlgmr.msra.gmra.mxu1 %vm140_vm1, %v65_v7  ;;  %v555_v8 = vld [vmem:[%s841_s6] ss:$0 sm:$0xff]  ;;  %p697_p13 = por %p696_p12, %p695_p11 }
  0x24   :  { %594 = vmatprep.mubr.msk.bf16.mxu1 %vm140_vm1, %v64_v5  ;;  %581 = vmatpush3.bf16.msra.mxu0 %v639_v9 }
  0x25   :  { %598 = vmatprep.subr.bf16.mxu0 %v722_v0  ;;  %593 = vmatpush3.bf16.msra.mxu1 %v640_v13  ;;  %p698_p0 = pnand %p697_p13, %p691_p10 }
  0x26   :  { %604 = vmatprep.subr.bf16.mxu1 %v722_v0 }
  0x27   :  { %583 = vmatmul.mubr.msk.bf16.vlgmr.msra.gmra.mxu0 %vm87_vm2, %v558_v12 }
  0x28   :  { %600 = vmatprep.mubr.msk.bf16.mxu0 %vm723_vm0, %v722_v0 }
  0x2b   :  { %595 = vmatmul.mubr.msk.bf16.vlgmr.msra.gmra.mxu1 %vm140_vm1, %v65_v7 }
  0x2c   :  { %606 = vmatprep.mubr.msk.bf16.mxu1 %vm723_vm0, %v722_v0 }
  0xe3   :  { %v590_v14 = vpop.f32.mrf.mxu1 }
  0xe5   :  { %v181_v15 = vpop.f32.mrf.mxu1 }
  0xe7   :  { %v591_v16 = vpop.f32.mrf.mxu1  ;;  %v125_v19 = vpop.f32.mrf.mxu0 }
  0xe8   :  { %v256_v17 = vpack.c.bf16 %v591_v16, %v590_v14  ;;  %v253_v27 = vpack.c.bf16 %v125_v19, %v125_v19 }
  0xe9   :  { %v184_v18 = vpop.f32.mrf.mxu1  ;;  %v584_v22 = vpop.f32.mrf.mxu0 }
  0xea   :  { %v307_v20 = vsel %vm140_vm1, %v256_v17, 0  ;;  %v255_v21 = vpack.c.bf16 %v184_v18, %v181_v15 }
  0xeb   :  { %605 = vmatpush3.bf16.xpose.msra.mxu1 %v307_v20  ;;  %v128_v24 = vpop.f32.mrf.mxu0  ;;  %v596_v28 = vpop.f32.mrf.mxu1 }
  0xec   :  { %v261_v23 = vsel %vm140_vm1, %v255_v21, 0  ;;  %616 = vmatprep.subr.bf16.mxu1 %v722_v0  ;;  %v254_v25 = vpack.c.bf16 %v128_v24, %v128_v24 }
  0xed   :  { %599 = vmatpush3.bf16.xpose.msra.mxu0 %v261_v23  ;;  %v585_v26 = vpop.f32.mrf.mxu0  ;;  %v238_v29 = vpop.f32.mrf.mxu1 }
  0xee   :  { %610 = vmatprep.subr.bf16.mxu0 %v722_v0 }
  0xef   :  { %v597_v30 = vpop.f32.mrf.mxu1 }
  0xf0   :  { %v370_v31 = vpack.c.bf16 %v597_v30, %v596_v28 }
  0xf1   :  { %v241_v32 = vpop.f32.mrf.mxu1 }
  0xf2   :  { %607 = vmatmul.mubr.msk.bf16.vlgmr.msra.gmra.mxu1 %vm140_vm1, %v254_v25  ;;  %v369_v33 = vpack.c.bf16 %v241_v32, %v238_v29 }
  0xf3   :  { %618 = vmatprep.mubr.msk.bf16.mxu1 %vm723_vm0, %v722_v0  ;;  %617 = vmatpush3.bf16.msra.mxu1 %v370_v31 }
  0xf4   :  { %601 = vmatmul.mubr.msk.bf16.vlgmr.msra.gmra.mxu0 %vm140_vm1, %v253_v27 }
  0xf5   :  { %612 = vmatprep.mubr.msk.bf16.mxu0 %vm723_vm0, %v722_v0  ;;  %611 = vmatpush3.bf16.msra.mxu0 %v369_v33 }
  0xf6   :  { %622 = vmatprep.subr.bf16.mxu0 %v722_v0 }
 0x1b2   :  { %v343_v34 = vpop.f32.mrf.mxu1 }
 0x1b3   :  { %v352_v42 = vsel %vm140_vm1, %v343_v34, -inf }
 0x1b4   :  { %v297_v35 = vpop.f32.mrf.mxu0  ;;  %v608_v36 = vpop.f32.mrf.mxu1 }
 0x1b5   :  { %v349_v37 = vsel %vm140_vm1, %v297_v35, -inf }
 0x1b6   :  { %v346_v38 = vpop.f32.mrf.mxu1  ;;  %350 = vmax.xlane.f32.xlu0 %v349_v37  ;;  %v602_v39 = vpop.f32.mrf.mxu0 }
 0x1b8   :  { %v300_v40 = vpop.f32.mrf.mxu0  ;;  %v609_v41 = vpop.f32.mrf.mxu1 }
 0x1ba   :  { %353 = vmax.xlane.f32.xlu0 %v352_v42  ;;  %v603_v43 = vpop.f32.mrf.mxu0 }
 0x23f   :  { %v351_v44 = vpop.xlane.xlu0 %350 }
 0x240   :  { %v355_v45 = vsub.f32 %v297_v35, %v351_v44 }
 0x242   :  { %v357_v46 = vmul.f32 1.442695, %v355_v45 }
 0x243   :  { %v354_v47 = vpop.xlane.xlu0 %353 }
 0x244   :  { %642 = vpow2.f32 %v357_v46  ;;  %v356_v48 = vsub.f32 %v343_v34, %v354_v47 }
 0x246   :  { %v359_v49 = vmul.f32 1.442695, %v356_v48 }
 0x248   :  { %644 = vpow2.f32 %v359_v49 }
 0x251   :  { %v643_v50 = vpop.eup %642 }
 0x252   :  { %v361_v51 = vsel %vm140_vm1, %v643_v50, 0.0  ;;  %v367_v52 = vpack.c.bf16 %v643_v50, %v643_v50 }
 0x253   :  { %362 = vadd.xlane.f32.xlu1 %v361_v51 }
 0x254   :  { %613 = vmatmul.mubr.msk.bf16.vlgmr.msra.gmra.mxu0 %vm140_vm1, %v367_v52 }
 0x255   :  { %v645_v53 = vpop.eup %644  ;;  %624 = vmatprep.mubr.msk.bf16.mxu0 %vm723_vm0, %v722_v0  ;;  %623 = vmatpush3.bf16.msra.mxu0 %v641_v56 }
 0x256   :  { %v364_v54 = vsel %vm140_vm1, %v645_v53, 0.0  ;;  %v368_v55 = vpack.c.bf16 %v645_v53, %v645_v53 }
 0x257   :  { %365 = vadd.xlane.f32.xlu1 %v364_v54 }
 0x258   :  { %619 = vmatmul.mubr.msk.bf16.vlgmr.msra.gmra.mxu1 %vm140_vm1, %v368_v55 }
 0x2dc   :  { %v363_v57 = vpop.xlane.xlu1 %362 }
 0x2dd   :  { %646 = vrcp.f32 %v363_v57 }
 0x2e0   :  { %v366_v58 = vpop.xlane.xlu1 %365 }
 0x2e1   :  { %648 = vrcp.f32 %v366_v58 }
 0x2ea   :  { %v647_v61 = vpop.eup %646 }
 0x2ee   :  { %v649_v62 = vpop.eup %648 }
 0x314   :  { %v408_v59 = vpop.f32.mrf.mxu0 }
 0x315   :  { %v459_v1 = vmul.f32 %v647_v61, %v408_v59 }
 0x316   :  { %v614_v60 = vpop.f32.mrf.mxu0 }
 0x318   :  { %v411_v63 = vpop.f32.mrf.mxu0  ;;  %v451_v0 = vpop.f32.mrf.mxu1 }
 0x319   :  { %v460_v2 = vmul.f32 %v649_v62, %v451_v0 }
 0x31a   :  { %v615_v3 = vpop.f32.mrf.mxu0  ;;  %v620_v4 = vpop.f32.mrf.mxu1 }
 0x31b   :  { %v461_v5 = vpack.c.bf16 %v460_v2, %v459_v1 }
 0x31c   :  { %v454_v6 = vpop.f32.mrf.mxu1 }
 0x31d   :  { %625 = vmatmul.mubr.msk.bf16.vlgmr.msra.gmra.mxu0 %vm140_vm1, %v461_v5 }
 0x31e   :  { %v621_v7 = vpop.f32.mrf.mxu1 }
 0x3dd   :  { %v514_v9 = vpop.f32.mrf.mxu0 }
 0x3de   :  { %v515_v10 = vadd.f32 %v555_v8, %v514_v9 }
 0x3df   :  { %v626_v11 = vpop.f32.mrf.mxu0 }
 0x3e0   :  { %521 = vst [vmem:[#allocation7] sm:$0xff] %v515_v10 }
 0x3e1   :  { %v517_v12 = vpop.f32.mrf.mxu0 }
 0x3e2   :  { %v518_v13 = vadd.f32 %v555_v8, %v517_v12 }
 0x3e3   :  { %v627_v14 = vpop.f32.mrf.mxu0 }
 0x3e4   :  { %522 = vst [vmem:[#allocation7 + $0x8] sm:$0xff] %v518_v13 }
 0x3e5   :  { %701 = shalt.err (!%p698_p0)
}
 0x3e6   :  { %534 = dma.vmem_to_hbm [thread:$0]  %s529_s24, 256, %s842_s7, [#allocation4], %s717_s27, %s717_s27, %s718_s28  }
 0x3e7   :  { %714 = dma.done.wait [#allocation4], 256  }
 0x3e8   :  { %715 = vsyncadd [#allocation4], 4294967040 }
 0x3e9   :  { %538 = vsyncpa [#allocation3], 1 }
 0x3ea   :  { %539 = vsyncpa [#allocation6], 1 }
 0x3eb   :  { %540 = vsyncpa [#allocation4], 1 }

</bundles_post_ra>
